<compile_context>
chip_gen: v6e
topology: v6e:2x2x1
jax: 0.10.0
libtpu: 0.0.40
codegen_flags: <defaults>
</compile_context>

<pallas_src>
import math
import functools

import jax
import jax.numpy as jnp
import numpy as np
from jax import lax
from jax.experimental import pallas as pl
from jax.experimental.pallas import tpu as pltpu


# ---------------------------------------------------------------------------
# Kernel 1: K/V projection over the concatenated KV source.
# Runs ONCE per KV row (grid (B, Skv//block_r)) — removes the n_q-fold
# projection redundancy of the previous design.
# ---------------------------------------------------------------------------
def _kv_proj_kernel(allh_ref, wkv_ref, bkv_ref, k_ref, v_ref):
    x = allh_ref[0]                                          # (block_r, H)
    k = jnp.dot(x, wkv_ref[0], preferred_element_type=jnp.float32) + bkv_ref[0]
    v = jnp.dot(x, wkv_ref[1], preferred_element_type=jnp.float32) + bkv_ref[1]
    k_ref[0] = k.astype(k_ref.dtype)
    v_ref[0] = v.astype(v_ref.dtype)


# ---------------------------------------------------------------------------
# Kernel 2: fused Q projection + flash attention over Skv tiles.
# grid = (B, n_q, n_k); scratch carries the online-softmax state across n_k.
# ---------------------------------------------------------------------------
def _flash_attn_kernel(hs_ref, k_ref, v_ref, mask_ref, wq_ref, bq_ref, out_ref,
                       q_s, m_s, l_s, acc_s, *, num_heads, head_dim,
                       approx_recip):
    ki = pl.program_id(2)

    @pl.when(ki == 0)
    def _():
        # Q projection for this q-tile (1/sqrt(dH) already folded into wq/bq);
        # executed once per (batch, q-tile), NOT per kv-tile.
        q = jnp.dot(hs_ref[0], wq_ref[...],
                    preferred_element_type=jnp.float32) + bq_ref[...]
        q_s[...] = q.astype(q_s.dtype)
        m_s[...] = jnp.full_like(m_s, -jnp.inf)
        l_s[...] = jnp.zeros_like(l_s)
        acc_s[...] = jnp.zeros_like(acc_s)

    k = k_ref[0]                                             # (block_k, H)
    v = v_ref[0]                                             # (block_k, H)
    mask = mask_ref[0]                                       # (1|block_q, block_k) f32

    # Per-head online softmax; each head writes straight into the f32 scratch
    # accumulator at its lane offset (no end-of-kernel concatenate).
    # NOTE: nn.Dropout(attention_probs_dropout_prob) is identity in eval mode.
    # TODO(synk): for num_heads >= 16 switch to lax.fori_loop(..., unroll=2);
    # for head_dim < 128 process head groups per matmul to fill the 128/256-wide
    # MXU; use scalar-prefetched metadata to skip fully-masked kv tiles.
    for h in range(num_heads):
        sl = slice(h * head_dim, (h + 1) * head_dim)
        qh = q_s[:, sl]                                      # (block_q, dH)
        kh = k[:, sl]                                        # (block_k, dH)
        vh = v[:, sl]                                        # (block_k, dH)
        # q @ k.T without materializing the transpose (contract last dims).
        s = lax.dot_general(qh, kh, (((1,), (1,)), ((), ())),
                            preferred_element_type=jnp.float32)  # (block_q, block_k)
        s = s + mask                                         # additive mask
        m_prev = m_s[h]                                      # (block_q, 1)
        m_new = jnp.maximum(m_prev, jnp.max(s, axis=-1, keepdims=True))
        alpha = jnp.exp(m_prev - m_new)
        p = jnp.exp(s - m_new)
        l_s[h] = alpha * l_s[h] + jnp.sum(p, axis=-1, keepdims=True)
        acc_s[:, sl] = alpha * acc_s[:, sl] + jnp.dot(
            p.astype(vh.dtype), vh, preferred_element_type=jnp.float32)
        m_s[h] = m_new

    @pl.when(ki == pl.num_programs(2) - 1)
    def _():
        # Normalize AFTER the PV matmul on (block_q, dH) tiles, then a single
        # lane-dense (block_q, H) cast + store.
        for h in range(num_heads):
            sl = slice(h * head_dim, (h + 1) * head_dim)
            if approx_recip:
                inv = pl.reciprocal(l_s[h], approx=True)
            else:
                inv = 1.0 / l_s[h]
            acc_s[:, sl] = acc_s[:, sl] * inv
        out_ref[0] = acc_s[...].astype(out_ref.dtype)


# ---------------------------------------------------------------------------
# Helpers
# ---------------------------------------------------------------------------
def _pick_block(dim, preferred):
    for b in preferred:
        if dim % b == 0:
            return b
    return dim   # fall back to the full extent (small / oddly sized dims)


def _vmem_limit(est_bytes):
    floor = 32 * 1024 * 1024
    try:
        cap = int(pltpu.get_tpu_info().vmem_capacity_bytes * 0.85)
    except Exception:
        cap = 56 * 1024 * 1024   # safe ceiling for v7x (64 MiB physical)
    cap = max(cap, floor)
    return int(min(max(2 * est_bytes, floor), cap))


# ---------------------------------------------------------------------------
# Wrapper
# ---------------------------------------------------------------------------
def incremental_attention(hidden_states, encoder_hidden_states, attention_mask,
                          wq, bq, wk, bk, wv, bv, *, num_heads,
                          block_q=None, block_k=None,
                          cast_operands_to_bf16=False, approx_recip=True):
    """hidden_states: (B, Sq, H); encoder_hidden_states: (B, Se, H);
    attention_mask: additive, broadcastable from (B,1,1,Skv) / (B,Skv) /
    (B,Sq,Skv) / (B,1,Sq,Skv); wq/wk/wv: (H,H) PyTorch Linear (out,in) layout;
    bq/bk/bv: (H,)."""
    B, Sq, H = hidden_states.shape
    Se = encoder_hidden_states.shape[1]
    Skv = Sq + Se
    assert H % num_heads == 0
    dH = H // num_heads
    out_dt = hidden_states.dtype
    # MXU operand dtype (v5e lever): f32 accumulation is kept regardless.
    op_dt = jnp.bfloat16 if cast_operands_to_bf16 else out_dt

    if block_q is None:
        block_q = _pick_block(Sq, (256, 128))
    if block_k is None:
        block_k = _pick_block(Skv, (512, 256, 128))
    block_r = _pick_block(Skv, (512, 256, 128))
    assert Sq % block_q == 0 and Skv % block_k == 0 and Skv % block_r == 0
    if Sq % 128 != 0 and Sq > 1024:
        # TODO(synk): masked tail q-tile for long, non-128-aligned sequences.
        raise NotImplementedError("long Sq must be a multiple of 128")
    n_q, n_k = Sq // block_q, Skv // block_k

    # K/V consume [hidden_states ; encoder_hidden_states]; the Q rows are the
    # first Sq rows of the same array (no duplicate hidden_states buffer).
    all_h = jnp.concatenate([hidden_states, encoder_hidden_states],
                            axis=1).astype(op_dt)            # (B, Skv, H)

    # Normalize additive mask to (B, Mq, Skv) with Mq in {1, Sq}; no (B,Sq,Skv)
    # blow-up when the caller passes a broadcast-1 query dim.
    m = attention_mask
    if m.ndim == 4:
        if m.shape[1] != 1:
            # TODO(synk): per-head (B, nH, Sq, Skv) masks not supported.
            raise NotImplementedError("per-head attention masks not supported")
        m = m[:, 0]
    elif m.ndim == 2:
        m = m[:, None, :]
    Mq = m.shape[1]
    assert Mq in (1, Sq), f"unsupported mask query dim {Mq}"
    m = jnp.broadcast_to(m, (B, Mq, Skv)).astype(jnp.float32)
    mblk_q = 1 if Mq == 1 else block_q
    mask_index = ((lambda b, qi, ki: (b, 0, ki)) if Mq == 1
                  else (lambda b, qi, ki: (b, qi, ki)))

    es = jnp.dtype(op_dt).itemsize

    # ------------------------------------------------------------ 1) K/V proj
    wkv = jnp.stack([wk.T, wv.T], axis=0).astype(op_dt)             # (2, H, H)
    bkv = jnp.stack([bk, bv], axis=0)[:, None, :].astype(jnp.float32)  # (2,1,H)

    kv_vmem = _vmem_limit(2 * block_r * H * es          # all_h tile (dbl buf)
                          + 2 * 2 * H * H * es          # wkv (dbl buf)
                          + 2 * 2 * block_r * H * es)   # k, v out tiles
    # TODO(synk): mark wkv/wq specs pl.Buffered(1) (constant index maps) once
    # single-buffered pipeline_mode is reliably supported, halving residency.
    k_all, v_all = pl.pallas_call(
        _kv_proj_kernel,
        out_shape=(jax.ShapeDtypeStruct((B, Skv, H), op_dt),
                   jax.ShapeDtypeStruct((B, Skv, H), op_dt)),
        grid_spec=pltpu.PrefetchScalarGridSpec(
            num_scalar_prefetch=0,
            grid=(B, Skv // block_r),
            in_specs=[
                pl.BlockSpec((1, block_r, H), lambda b, r: (b, r, 0)),
                pl.BlockSpec((2, H, H), lambda b, r: (0, 0, 0)),      # resident
                pl.BlockSpec((2, 1, H), lambda b, r: (0, 0, 0)),      # resident
            ],
            out_specs=[
                pl.BlockSpec((1, block_r, H), lambda b, r: (b, r, 0)),
                pl.BlockSpec((1, block_r, H), lambda b, r: (b, r, 0)),
            ],
        ),
        compiler_params=pltpu.CompilerParams(
            dimension_semantics=("parallel", "parallel"),
            vmem_limit_bytes=kv_vmem),
    )(all_h, wkv, bkv)

    # -------------------------------------------------------- 2) flash attn
    scale = 1.0 / math.sqrt(dH)
    wq_s = (wq.T * scale).astype(op_dt)                    # (H, H), in->out, pre-scaled
    bq_s = (bq * scale)[None, :].astype(jnp.float32)       # (1, H), pre-scaled

    attn_vmem = _vmem_limit(2 * block_q * H * es                 # q-tile source
                            + 2 * 2 * block_k * H * es           # k, v tiles
                            + 2 * mblk_q * block_k * 4           # mask tile
                            + 2 * (H * H * es + H * 4)           # wq, bq
                            + 2 * block_q * H * es               # out tile
                            + block_q * H * es                   # q scratch
                            + 2 * num_heads * block_q * 4        # m, l scratch
                            + block_q * H * 4)                   # acc scratch

    kernel = functools.partial(_flash_attn_kernel, num_heads=num_heads,
                               head_dim=dH, approx_recip=approx_recip)

    return pl.pallas_call(
        kernel,
        out_shape=jax.ShapeDtypeStruct((B, Sq, H), out_dt),
        grid_spec=pltpu.PrefetchScalarGridSpec(
            num_scalar_prefetch=0,
            grid=(B, n_q, n_k),
            in_specs=[
                # Q rows = first Sq rows of all_h (resident across the kv axis).
                pl.BlockSpec((1, block_q, H), lambda b, qi, ki: (b, qi, 0)),
                pl.BlockSpec((1, block_k, H), lambda b, qi, ki: (b, ki, 0)),
                pl.BlockSpec((1, block_k, H), lambda b, qi, ki: (b, ki, 0)),
                pl.BlockSpec((1, mblk_q, block_k), mask_index),
                pl.BlockSpec((H, H), lambda b, qi, ki: (0, 0)),       # resident
                pl.BlockSpec((1, H), lambda b, qi, ki: (0, 0)),       # resident
            ],
            out_specs=pl.BlockSpec((1, block_q, H), lambda b, qi, ki: (b, qi, 0)),
            scratch_shapes=[
                pltpu.VMEM((block_q, H), op_dt),                    # projected Q
                pltpu.VMEM((num_heads, block_q, 1), jnp.float32),   # running max
                pltpu.VMEM((num_heads, block_q, 1), jnp.float32),   # running sum
                pltpu.VMEM((block_q, H), jnp.float32),              # output acc
            ],
        ),
        compiler_params=pltpu.CompilerParams(
            dimension_semantics=("parallel", "parallel", "arbitrary"),
            vmem_limit_bytes=attn_vmem),
    )(all_h, k_all, v_all, m, wq_s, bq_s)


# ---------------------------------------------------------------------------
# Pure-JAX reference
# ---------------------------------------------------------------------------
def _reference(hidden_states, encoder_hidden_states, attention_mask,
               wq, bq, wk, bk, wv, bv, *, num_heads):
    B, Sq, H = hidden_states.shape
    dH = H // num_heads

    def proj(x, w, b):
        return x @ w.T + b

    def split(x):
        return jnp.transpose(x.reshape(x.shape[0], x.shape[1], num_heads, dH),
                             (0, 2, 1, 3))

    q = split(proj(hidden_states, wq, bq))
    all_h = jnp.concatenate([hidden_states, encoder_hidden_states], axis=1)
    k = split(proj(all_h, wk, bk))
    v = split(proj(all_h, wv, bv))
    scores = jnp.einsum("bhqd,bhkd->bhqk", q, k) / math.sqrt(dH)
    scores = scores + attention_mask
    probs = jax.nn.softmax(scores, axis=-1)
    ctx = jnp.einsum("bhqk,bhkd->bhqd", probs, v)
    return jnp.transpose(ctx, (0, 2, 1, 3)).reshape(B, Sq, H)


if __name__ == "__main__":
    def make_params(key, H):
        ks = jax.random.split(key, 6)
        s = 1.0 / math.sqrt(H)
        wq = jax.random.uniform(ks[0], (H, H), jnp.float32, -s, s)
        wk = jax.random.uniform(ks[1], (H, H), jnp.float32, -s, s)
        wv = jax.random.uniform(ks[2], (H, H), jnp.float32, -s, s)
        bq = jax.random.uniform(ks[3], (H,), jnp.float32, -s, s)
        bk = jax.random.uniform(ks[4], (H,), jnp.float32, -s, s)
        bv = jax.random.uniform(ks[5], (H,), jnp.float32, -s, s)
        return wq, bq, wk, bk, wv, bv

    root = jax.random.PRNGKey(0)
    k1a, k1b, k1p, k2a, k2b, k2m, k2p = jax.random.split(root, 7)

    # Case 1: module's tiny config (hidden_size=32, heads=4), single-tile path,
    # HF-style (B, 1, 1, Skv) additive mask.
    B, Sq, Se, H, nH = 2, 8, 8, 32, 4
    Skv = Sq + Se
    hs = jax.random.normal(k1a, (B, Sq, H), jnp.float32)
    enc = jax.random.normal(k1b, (B, Se, H), jnp.float32)
    params = make_params(k1p, H)
    pad = jnp.zeros((B, Skv), jnp.float32).at[1, -3:].set(-1e9)
    mask = pad[:, None, None, :]
    out = incremental_attention(hs, enc, mask, *params, num_heads=nH)
    out = jax.block_until_ready(out)
    ref = _reference(hs, enc, mask, *params, num_heads=nH)
    # tolerance accounts for the EUP approximate reciprocal in the softmax denom
    np.testing.assert_allclose(np.asarray(out), np.asarray(ref),
                               rtol=2e-3, atol=2e-3)

    # Case 2: multi-tile flash path (n_q=2, n_k=3) with a (B, 1, Sq, Skv) mask,
    # exercising the online softmax carry and q-tile re-init.
    B, Sq, Se, H, nH = 2, 256, 128, 32, 4
    Skv = Sq + Se
    hs = jax.random.normal(k2a, (B, Sq, H), jnp.float32)
    enc = jax.random.normal(k2b, (B, Se, H), jnp.float32)
    params = make_params(k2p, H)
    mask = (jax.random.uniform(k2m, (B, 1, Sq, Skv)) < 0.2).astype(jnp.float32) * -1e9
    out = incremental_attention(hs, enc, mask, *params, num_heads=nH,
                                block_q=128, block_k=128)
    out = jax.block_until_ready(out)
    ref = _reference(hs, enc, mask, *params, num_heads=nH)
    np.testing.assert_allclose(np.asarray(out), np.asarray(ref),
                               rtol=2e-3, atol=2e-3)

    print("KERNEL_OK")
</pallas_src>

<mosaic_0001>
module attributes {stable_mosaic.version = 11 : i64} {
  func.func @_kv_proj_kernel(%arg0: i32, %arg1: i32, %arg2: memref<1x16x32xf32, #tpu.memory_space<vmem>>, %arg3: memref<2x32x32xf32, #tpu.memory_space<vmem>>, %arg4: memref<2x1x32xf32, #tpu.memory_space<vmem>>, %arg5: memref<1x16x32xf32, #tpu.memory_space<vmem>>, %arg6: memref<1x16x32xf32, #tpu.memory_space<vmem>>) attributes {dimension_semantics = [#tpu.dimension_semantics<parallel>, #tpu.dimension_semantics<parallel>], iteration_bounds = array<i64: 2, 1>, scalar_prefetch = 0 : i64, scratch_operands = 0 : i64, tpu.core_type = #tpu.core_type<tc>, window_params = [{transform_indices = @transform_0, window_bounds = array<i64: 1, 16, 32>}, {pipeline_mode = #tpu.pipeline_mode<synchronous>, transform_indices = @transform_1, window_bounds = array<i64: 2, 32, 32>}, {pipeline_mode = #tpu.pipeline_mode<synchronous>, transform_indices = @transform_2, window_bounds = array<i64: 2, 1, 32>}, {transform_indices = @transform_3, window_bounds = array<i64: 1, 16, 32>}, {transform_indices = @transform_4, window_bounds = array<i64: 1, 16, 32>}]} {
    %c0 = arith.constant 0 : index
    %c0_0 = arith.constant 0 : index
    %c0_1 = arith.constant 0 : index
    %0 = vector.load %arg2[%c0, %c0_0, %c0_1] : memref<1x16x32xf32, #tpu.memory_space<vmem>>, vector<1x16x32xf32>
    %1 = vector.shape_cast %0 : vector<1x16x32xf32> to vector<16x32xf32>
    %c0_2 = arith.constant 0 : index
    %c0_3 = arith.constant 0 : index
    %c0_4 = arith.constant 0 : index
    %2 = vector.load %arg3[%c0_2, %c0_3, %c0_4] : memref<2x32x32xf32, #tpu.memory_space<vmem>>, vector<1x32x32xf32>
    %3 = vector.shape_cast %2 : vector<1x32x32xf32> to vector<32x32xf32>
    %cst = arith.constant dense<0.000000e+00> : vector<16x32xf32>
    %4 = tpu.matmul %1, %3, %cst {dimension_numbers = #tpu.dot_dimension_numbers<[1], [0], [0], [1], [0, 0, 1, 1], [], []>} : vector<16x32xf32>, vector<32x32xf32>, vector<16x32xf32> -> vector<16x32xf32>
    %c0_5 = arith.constant 0 : index
    %c0_6 = arith.constant 0 : index
    %c0_7 = arith.constant 0 : index
    %5 = vector.load %arg4[%c0_5, %c0_6, %c0_7] : memref<2x1x32xf32, #tpu.memory_space<vmem>>, vector<1x1x32xf32>
    %6 = vector.shape_cast %5 : vector<1x1x32xf32> to vector<1x32xf32>
    %7 = vector.broadcast %6 : vector<1x32xf32> to vector<16x32xf32>
    %8 = arith.addf %4, %7 : vector<16x32xf32>
    %c1 = arith.constant 1 : index
    %c0_8 = arith.constant 0 : index
    %c0_9 = arith.constant 0 : index
    %9 = vector.load %arg3[%c1, %c0_8, %c0_9] : memref<2x32x32xf32, #tpu.memory_space<vmem>>, vector<1x32x32xf32>
    %10 = vector.shape_cast %9 : vector<1x32x32xf32> to vector<32x32xf32>
    %cst_10 = arith.constant dense<0.000000e+00> : vector<16x32xf32>
    %11 = tpu.matmul %1, %10, %cst_10 {dimension_numbers = #tpu.dot_dimension_numbers<[1], [0], [0], [1], [0, 0, 1, 1], [], []>} : vector<16x32xf32>, vector<32x32xf32>, vector<16x32xf32> -> vector<16x32xf32>
    %c1_11 = arith.constant 1 : index
    %c0_12 = arith.constant 0 : index
    %c0_13 = arith.constant 0 : index
    %12 = vector.load %arg4[%c1_11, %c0_12, %c0_13] : memref<2x1x32xf32, #tpu.memory_space<vmem>>, vector<1x1x32xf32>
    %13 = vector.shape_cast %12 : vector<1x1x32xf32> to vector<1x32xf32>
    %14 = vector.broadcast %13 : vector<1x32xf32> to vector<16x32xf32>
    %15 = arith.addf %11, %14 : vector<16x32xf32>
    %c0_14 = arith.constant 0 : index
    %c0_15 = arith.constant 0 : index
    %c0_16 = arith.constant 0 : index
    %16 = vector.load %arg5[%c0_14, %c0_15, %c0_16] : memref<1x16x32xf32, #tpu.memory_space<vmem>>, vector<1x16x32xf32>
    %17 = vector.shape_cast %16 : vector<1x16x32xf32> to vector<16x32xf32>
    %18 = vector.shape_cast %8 : vector<16x32xf32> to vector<1x16x32xf32>
    tpu.vector_store %arg5[%c0_14, %c0_15, %c0_16], %18 {strides = array<i32>} : memref<1x16x32xf32, #tpu.memory_space<vmem>>, vector<1x16x32xf32>,
    %c0_17 = arith.constant 0 : index
    %c0_18 = arith.constant 0 : index
    %c0_19 = arith.constant 0 : index
    %19 = vector.load %arg6[%c0_17, %c0_18, %c0_19] : memref<1x16x32xf32, #tpu.memory_space<vmem>>, vector<1x16x32xf32>
    %20 = vector.shape_cast %19 : vector<1x16x32xf32> to vector<16x32xf32>
    %21 = vector.shape_cast %15 : vector<16x32xf32> to vector<1x16x32xf32>
    tpu.vector_store %arg6[%c0_17, %c0_18, %c0_19], %21 {strides = array<i32>} : memref<1x16x32xf32, #tpu.memory_space<vmem>>, vector<1x16x32xf32>,
    return
  }
  func.func @transform_0(%arg0: i32, %arg1: i32) -> (i32, i32, i32) {
    %c0_i32 = arith.constant 0 : i32
    %c0_i32_0 = arith.constant 0 : i32
    return %arg0, %arg1, %c0_i32 : i32, i32, i32
  }
  func.func @transform_1(%arg0: i32, %arg1: i32) -> (i32, i32, i32) {
    %c0_i32 = arith.constant 0 : i32
    %c0_i32_0 = arith.constant 0 : i32
    %c0_i32_1 = arith.constant 0 : i32
    %c0_i32_2 = arith.constant 0 : i32
    return %c0_i32, %c0_i32_0, %c0_i32_1 : i32, i32, i32
  }
  func.func @transform_2(%arg0: i32, %arg1: i32) -> (i32, i32, i32) {
    %c0_i32 = arith.constant 0 : i32
    %c0_i32_0 = arith.constant 0 : i32
    %c0_i32_1 = arith.constant 0 : i32
    %c0_i32_2 = arith.constant 0 : i32
    return %c0_i32, %c0_i32_0, %c0_i32_1 : i32, i32, i32
  }
  func.func @transform_3(%arg0: i32, %arg1: i32) -> (i32, i32, i32) {
    %c0_i32 = arith.constant 0 : i32
    %c0_i32_0 = arith.constant 0 : i32
    return %arg0, %arg1, %c0_i32 : i32, i32, i32
  }
  func.func @transform_4(%arg0: i32, %arg1: i32) -> (i32, i32, i32) {
    %c0_i32 = arith.constant 0 : i32
    %c0_i32_0 = arith.constant 0 : i32
    return %arg0, %arg1, %c0_i32 : i32, i32, i32
  }
}

</mosaic_0001>

<bundles_post_ra>
// kernel: tpu_custom_call.1
= control target key start
LH: loop header
LB: loop body
LE: loop exit
PB: predicated region body
PF: predicated region fallthrough
CT: control target
= control target key end

     0   :  { %s1213_s0 = inlined_call_operand.hbm [shape: f32[2,16,32], index: 0, kind: input, shape index: {}]   ;;  %s1214_s1 = inlined_call_operand.hbm [shape: f32[2,32,32], index: 1, kind: input, shape index: {}]   ;;  %s1215_s2 = inlined_call_operand.vmem [shape: f32[2,1,32], index: 2, kind: input, shape index: {}]   ;;  %s1216_s3 = inlined_call_operand.hbm [shape: f32[2,16,32], index: 3, kind: output, shape index: {0}]   ;;  %s1217_s4 = inlined_call_operand.hbm [shape: f32[2,16,32], index: 4, kind: output, shape index: {1}]  }
   0x1   :  { %1221 = sst [smem:[#allocation14_spill]] %s1214_s1 }
   0x2   :  { %10 = vsyncpa [#allocation3], 0 }
   0x3   :  { %12 = vsyncpa [#allocation3 + $0x1], 0 }
   0x4   :  { %13 = vsyncpa [#allocation6], 0 }
   0x5   :  { %14 = vsyncpa [#allocation4], 0 }
   0x6   :  { %16 = vsyncpa [#allocation4 + $0x1], 0 }
   0x7   :  { %17 = vsyncpa [#allocation9], 0 }
   0x8   :  { %19 = vsyncpa [#allocation9 + $0x1], 0  ;;  %s973_s15 = smov 0   ;;  %s975_s16 = smov 0  }
   0x9   :  { %s977_s17 = smov 0   ;;  %s979_s18 = smov 0  }
   0xa   :  { %s981_s19 = smov 0   ;;  %s983_s20 = smov 0  }
   0xb LB: > { %s623_s21 = sadd.s32 4294967295, %s938_s20   ;;  %s624_s22 = sadd.s32 4294967294, %s938_s20   ;;  %s938_s20 = sphi %s983_s20, %s25_s20   ;;  %s934_s19 = sphi %s981_s19, %s1241_s19   ;;  %s930_s18 = sphi %s979_s18, %s1240_s18   ;;  %s926_s17 = sphi %s977_s17, %s1239_s17   ;;  %s922_s16 = sphi %s975_s16, %s1238_s16   ;;  %s918_s15 = sphi %s973_s15, %s1237_s15  }
   0xc   : > { %p59_p0 = scmp.ne.s32.totalorder %s922_s16, %s918_s15  ;;  %p1007_p1 = scmp.eq.s32.totalorder %s623_s21, 0 }
   0xd   : > { %p1011_p2 = scmp.eq.s32.totalorder %s623_s21, 1  ;;  %p133_p3 = scmp.eq.s32.totalorder %s624_s22, 1 }
   0xe   : > { %p1017_p4 = por %p1007_p1, %p59_p0  ;;  %p625_p5 = scmp.ge.s32.totalorder %s938_s20, 1 }
   0xf   : > { %p1022_p6 = por %p133_p3, %p59_p0  ;;  %p168_p7 = scmp.lt.s32.totalorder %s938_s20, 3 }
  0x10   : > { %s1224_s25 = scalar_select %p1017_p4, 1, 0 }
  0x11   : > { %s1225_s26 = scalar_select %p1022_p6, 1, 0 }
  0x12   : > { %p1027_p8 = pnand %p625_p5, %p168_p7  ;;  %s940_s28 = smov [#allocation5]  }
  0x13   : > { %s180_s29 = sshll.u32 %s940_s28, 4  ;;  %s37_s5 = sadd.s32 1, %s934_s19  ;;  %s181_s29 = int_to_ptr.vmem [resolvable:$true] %s180_s29 }
  0x14   : > { %p698_p9 = pneg %p1027_p8  ;;  %s781_s6 = scalar_lea.vmem %s181_s29, 1024 }
  0x15   : > { %p782_p13 = scmp.ne.s32.totalorder %s181_s29, %s781_s6  ;;  %p789_p5 = scmp.lt.s32.totalorder %s181_s29, %s181_s29 }
  0x16   : > { %p1036_p11 = pnand %p698_p9, %p1007_p1  ;;  %p790_p7 = scmp.lt.s32.totalorder %s781_s6, %s781_s6 }
  0x18   : > { %p772_p12 = pneg %p1036_p11  ;;  %p791_p6 = por %p790_p7, %p789_p5 }
  0x1a   : > { %p784_p0 = pnand %p782_p13, %p772_p12 }
  0x1c   : > { %p785_p3 = pneg %p784_p0 }
  0x1e   : > { %p792_p4 = pnand %p791_p6, %p785_p3 }
  0x20   : > { %795 = shalt.err (!%p792_p4)
}
  0x21   : > { %s1219_s7 = smov 128   ;;  %s1220_s8 = smov 8  }
  0x22   : > { %s1228_s1 = sld [smem:[#allocation14_spill]]  ;;  %p39_p4 = scmp.ge.s32.totalorder %s37_s5, 2 }
  0x23   : > { %s46_s11 = sadd.s32 1, %s926_s17  ;;  %p53_p6 = scmp.ne.s32.totalorder %s926_s17, %s922_s16 }
  0x24   : > { %p54_p9 = scmp.eq.s32.totalorder %s938_s20, 0  ;;  %s1243_s5 = smov (%p39_p4, %s37_s5), 0 }
  0x25   : > { %p1063_p13 = por %p1011_p2, %p53_p6  ;;  %s41_s14 = ssub.s32 %s934_s19, %s1243_s5 }
  0x26   : > { %p1057_p12 = por %p54_p9, %p53_p6  ;;  %p714_p0 = scmp.lt.s32.totalorder %s938_s20, 2 }
  0x27   : > { %s197_s21 = sand.u32 1, %s926_s17  }
  0x28   : > { %701 = dma.hbm_to_vmem [thread:$0]  (!%p1036_p11), %s1228_s1, 1024, %s181_s29, [#allocation6], %s1219_s7, %s1219_s7, %s1220_s8  }
  0x29   : > { %p44_p11 = scmp.eq.s32.totalorder %s41_s14, 0  ;;  %s628_s22 = sshll.u32 %s197_s21, 4 }
  0x2a   : > { %s651_s29 = sshll.u32 %s934_s19, 8  ;;  %s201_s10 = scalar_lea.vmem [#allocation2], %s628_s22 }
  0x2b   : > { %s1072_s28 = scalar_select %p44_p11, %s926_s17, %s46_s11  }
  0x2c   : > { %s209_s9 = scalar_lea.hbm %s1213_s0, %s651_s29  ;;  %s210_s7 = sshll.u32 %s201_s10, 4  ;;  %s211_s7 = int_to_ptr.vmem [resolvable:$true] %s210_s7 }
  0x2d   : > { %p1080_p2 = pnand %p714_p0, %p1057_p12  ;;  %s198_s8 = scalar_lea.sflag [#allocation3], %s197_s21 }
  0x2e   : > { %s809_s14 = scalar_lea.vmem %s211_s7, 256  ;;  %s943_s11 = smov [#allocation2]  }
  0x2f   : > { %p798_p3 = pneg %p1080_p2  ;;  %p810_p5 = scmp.ne.s32.totalorder %s211_s7, %s809_s14 }
  0x30   : > { %s814_s1 = sshll.u32 %s943_s11, 4  ;;  %s815_s1 = int_to_ptr.vmem [resolvable:$false] %s814_s1 }
  0x31   : > { %p812_p7 = pnand %p810_p5, %p798_p3  ;;  %s816_s29 = scalar_lea.vmem %s815_s1, 512 }
  0x32   : > { %p817_p6 = scmp.lt.s32.totalorder %s211_s7, %s815_s1  ;;  %p818_p9 = scmp.lt.s32.totalorder %s816_s29, %s809_s14 }
  0x33   : > { %p813_p4 = pneg %p812_p7 }
  0x34   : > { %p819_p11 = por %p818_p9, %p817_p6 }
  0x36   : > { %p820_p10 = pnand %p819_p11, %p813_p4 }
  0x38   : > { %823 = shalt.err (!%p820_p10)
}
  0x39   : > { %s1232_s12 = smov 8   ;;  %s1233_s22 = smov 128  }
  0x3a   : > { %705 = dma.hbm_to_vmem [thread:$0]  (!%p1080_p2), %s209_s9, 256, %s211_s7, %s198_s8, %s1233_s22, %s1233_s22, %s1232_s12  }
  0x3b   : > { %222 = sbr.rel (%p1027_p8) target bundleno = 311 (0x137), region = 32  ;;  %s1094_s21 = sand.u32 (!%p1027_p8), 1, %s922_s16  }
  0x3c   : > { %s1097_s1 = sshll.u32 (!%p1027_p8), %s1094_s21, 4  ;;  %s225_s30 = scalar_lea.sflag (!%p1027_p8), [#allocation3], %s1094_s21 }
  0x3d   : > { %s228_s6 = scalar_lea.vmem (!%p1027_p8), [#allocation2], %s1097_s1  ;;  %p1234_p10 = scmp.ne.s32.totalorder (!%p1027_p8), %s1224_s25, 0 }
  0x40   : > { %901 = dma.done.wait (%p1234_p10), %s225_s30, 256  }
  0x41   : > { %903 = vsyncadd (%p1234_p10), %s225_s30, 4294967040 }
  0x42   : > { %905 = dma.done.wait (%p1007_p1), [#allocation6], 1024  }
  0x43   : > { %907 = vsyncadd (%p1007_p1), [#allocation6], 4294966272  ;;  %v270_v0 = vld [vmem:[#allocation5 + $0x18] sm:$0xff]  ;;  %v269_v2 = vld [vmem:[#allocation5 + $0x10] sm:$0xff]  ;;  %vm278_vm0 = vcmask 261120   ;;  %s254_s27 = scalar_lea.vmem [#allocation7], %s1097_s1 }
  0x44   : > { %v364_v1 = vld [vmem:[#allocation5 + $0x38] sm:$0xff]  ;;  %666 = vmatprep.subr.mxu0 %v270_v0  ;;  %v363_v3 = vld [vmem:[#allocation5 + $0x30] sm:$0xff]  ;;  %v268_v4 = vld [vmem:[#allocation5 + $0x8] sm:$0xff]  ;;  %s473_s7 = sshll.u32 %s254_s27, 4  ;;  %s261_s10 = scalar_lea.vmem [#allocation8], %s1097_s1  ;;  %s1122_s7 = int_to_ptr.vmem [resolvable:$true] %s473_s7 }
  0x45   : > { %677 = vmatprep.subr.mxu1 %v364_v1  ;;  %667 = vmatpush3.msra.mxu0 %v270_v0  ;;  %v362_v5 = vld [vmem:[#allocation5 + $0x28] sm:$0xff]  ;;  %v267_v6 = vld [vmem:[#allocation5] sm:$0xff]  ;;  %s491_s24 = sshll.u32 %s261_s10, 4  ;;  %s652_s14 = sshll.u32 %s930_s18, 8  ;;  %s1124_s24 = int_to_ptr.vmem [resolvable:$true] %s491_s24 }
  0x46   : > { %678 = vmatpush3.msra.mxu1 %v364_v1  ;;  %668 = vmatprep.subr.mxu0 %v269_v2  ;;  %v361_v7 = vld [vmem:[#allocation5 + $0x20] sm:$0xff]  ;;  %v266_v9 = vld [vmem:[%s228_s6 + $0x8] sm:$0xff]  ;;  %s1129_s12 = scalar_lea.hbm %s1216_s3, %s652_s14  ;;  %s1136_s1 = scalar_lea.hbm %s1217_s4, %s652_s14 }
  0x47   : > { %679 = vmatprep.subr.mxu1 %v363_v3  ;;  %669 = vmatpush3.msra.mxu0 %v269_v2  ;;  %v265_v8 = vld [vmem:[%s228_s6] sm:$0xff]  ;;  %s453_s30 = scalar_lea.sflag [#allocation4], %s1094_s21  ;;  %s824_s6 = scalar_lea.vmem %s1122_s7, 256 }
  0x48   : > { %680 = vmatpush3.msra.mxu1 %v363_v3  ;;  %670 = vmatprep.subr.mxu0 %v268_v4  ;;  %v636_v10 = vld [vmem:[%s1215_s2] ss:$0 sm:$0xff]  ;;  %v640_v11 = vld [vmem:[%s1215_s2 + $0x1] ss:$0 sm:$0xff]  ;;  %p825_p1 = scmp.ne.s32.totalorder %s1122_s7, %s824_s6  ;;  %s944_s23 = smov [#allocation7]  }
  0x49   : > { %681 = vmatprep.subr.mxu1 %v362_v5  ;;  %671 = vmatpush3.msra.mxu0 %v268_v4  ;;  %s828_s25 = sshll.u32 %s944_s23, 4  ;;  %s829_s25 = int_to_ptr.vmem [resolvable:$false] %s828_s25 }
  0x4a   : > { %682 = vmatpush3.msra.mxu1 %v362_v5  ;;  %672 = vmatprep.subr.mxu0 %v267_v6  ;;  %p826_p8 = pnand %p825_p1, %p1063_p13  ;;  %s830_s8 = scalar_lea.vmem %s829_s25, 512 }
  0x4b   : > { %683 = vmatprep.subr.mxu1 %v361_v7  ;;  %673 = vmatpush3.msra.mxu0 %v267_v6  ;;  %p831_p0 = scmp.lt.s32.totalorder %s1122_s7, %s829_s25  ;;  %p832_p2 = scmp.lt.s32.totalorder %s830_s8, %s824_s6 }
  0x4c   : > { %674 = vmatprep.mubr.msk.f32.mxu0 %vm278_vm0, %v265_v8  ;;  %684 = vmatpush3.msra.mxu1 %v361_v7  ;;  %p827_p12 = pneg %p826_p8 }
  0x4d   : > { %685 = vmatprep.mubr.msk.f32.mxu1 %vm278_vm0, %v265_v8  ;;  %675 = vmatmul.mubr.msk.f32.vlgmr.msra.gmra.mxu0 %vm278_vm0, %v266_v9  ;;  %p833_p3 = por %p832_p2, %p831_p0 }
  0x4e   : > { %686 = vmatmul.mubr.msk.f32.vlgmr.msra.gmra.mxu1 %vm278_vm0, %v266_v9 }
  0x4f   : > { %p834_p5 = pnand %p833_p3, %p827_p12 }
 0x10d   : > { %v676_v12 = vpop.f32.mrf.mxu0 }
 0x10e   : > { %v687_v13 = vpop.f32.mrf.mxu1  ;;  %v357_v14 = vadd.f32 %v676_v12, %v636_v10 }
 0x10f   : > { %v445_v15 = vadd.f32 %v687_v13, %v640_v11  ;;  %v351_v16 = vpop.f32.mrf.mxu0 }
 0x110   : > { %v439_v17 = vpop.f32.mrf.mxu1  ;;  %449 = vst.msk [vmem:[%s254_s27 + $0x8] sm:$0xff] %vm278_vm0, %v357_v14  ;;  %v352_v18 = vadd.f32 %v636_v10, %v351_v16 }
 0x111   : > { %451 = vst.msk [vmem:[%s261_s10 + $0x8] sm:$0xff] %vm278_vm0, %v445_v15  ;;  %v440_v19 = vadd.f32 %v640_v11, %v439_v17 }
 0x112   : > { %448 = vst.msk [vmem:[%s254_s27] sm:$0xff] %vm278_vm0, %v352_v18 }
 0x113   : > { %450 = vst.msk [vmem:[%s261_s10] sm:$0xff] %vm278_vm0, %v440_v19 }
 0x114   : > { %837 = shalt.err (!%p834_p5)
}
 0x115   : > { %s838_s27 = scalar_lea.hbm %s1129_s12, 256  ;;  %s842_s14 = scalar_lea.hbm %s1216_s3, 512 }
 0x116   : > { %p839_p7 = scmp.ne.s32.totalorder %s1129_s12, %s838_s27  ;;  %p843_p9 = scmp.lt.s32.totalorder %s1129_s12, %s1216_s3 }
 0x117   : > { %p844_p11 = scmp.lt.s32.totalorder %s842_s14, %s838_s27 }
 0x118   : > { %p840_p4 = pnand %p839_p7, %p1063_p13 }
 0x119   : > { %p845_p10 = por %p844_p11, %p843_p9 }
 0x11a   : > { %p841_p6 = pneg %p840_p4 }
 0x11c   : > { %p846_p1 = pnand %p845_p10, %p841_p6 }
 0x11e   : > { %849 = shalt.err (!%p846_p1)
}
 0x11f   : > { %s945_s18 = smov 128   ;;  %s946_s22 = smov 8  }
 0x120   : > { %694 = dma.vmem_to_hbm [thread:$0]  (%p1063_p13), %s1122_s7, 256, %s1129_s12, %s453_s30, %s945_s18, %s945_s18, %s946_s22  }
 0x121   : > { %s458_s6 = scalar_lea.sflag [#allocation9], %s1094_s21  ;;  %s850_s23 = scalar_lea.vmem %s1124_s24, 256 }
 0x122   : > { %p851_p8 = scmp.ne.s32.totalorder %s1124_s24, %s850_s23  ;;  %s947_s25 = smov [#allocation8]  }
 0x123   : > { %s854_s8 = sshll.u32 %s947_s25, 4  ;;  %s855_s8 = int_to_ptr.vmem [resolvable:$false] %s854_s8 }
 0x124   : > { %p852_p12 = pnand %p851_p8, %p1063_p13  ;;  %s856_s27 = scalar_lea.vmem %s855_s8, 512 }
 0x125   : > { %p857_p2 = scmp.lt.s32.totalorder %s1124_s24, %s855_s8  ;;  %p858_p3 = scmp.lt.s32.totalorder %s856_s27, %s850_s23 }
 0x126   : > { %p853_p0 = pneg %p852_p12 }
 0x127   : > { %p859_p5 = por %p858_p3, %p857_p2 }
 0x129   : > { %p860_p7 = pnand %p859_p5, %p853_p0 }
 0x12b   : > { %863 = shalt.err (!%p860_p7)
}
 0x12c   : > { %s864_s7 = scalar_lea.hbm %s1136_s1, 256  ;;  %s868_s30 = scalar_lea.hbm %s1217_s4, 512 }
 0x12d   : > { %p865_p4 = scmp.ne.s32.totalorder %s1136_s1, %s864_s7  ;;  %p869_p11 = scmp.lt.s32.totalorder %s1136_s1, %s1217_s4 }
 0x12e   : > { %p870_p10 = scmp.lt.s32.totalorder %s868_s30, %s864_s7 }
 0x12f   : > { %p866_p6 = pnand %p865_p4, %p1063_p13 }
 0x130   : > { %p871_p1 = por %p870_p10, %p869_p11 }
 0x131   : > { %p867_p9 = pneg %p866_p6 }
 0x133   : > { %p872_p8 = pnand %p871_p1, %p867_p9 }
 0x135   : > { %875 = shalt.err (!%p872_p8)
}
 0x136   : > { %695 = dma.vmem_to_hbm [thread:$0]  (%p1063_p13), %s1124_s24, 256, %s1136_s1, %s458_s6, %s945_s18, %s945_s18, %s946_s22  }
 0x137 PF: > { %s506_s14 = sand.u32 1, %s918_s15   ;;  %p1235_p12 = scmp.ne.s32.totalorder %s1225_s26, 0 }
 0x138   : > { %p1236_p0 = scmp.ge.s32.totalorder %s938_s20, 2  ;;  %s507_s11 = scalar_lea.sflag [#allocation4], %s506_s14 }
 0x13a   : > { %p707_p2 = pnand %p1236_p0, %p1235_p12 }
 0x13c   : > { %p708_p3 = pneg %p707_p2 }
 0x13e   : > { %909 = dma.done.wait (%p708_p3), %s507_s11, 256  }
 0x13f   : > { %911 = vsyncadd (%p708_p3), %s507_s11, 4294967040  ;;  %s516_s29 = scalar_lea.sflag [#allocation9], %s506_s14 }
 0x140   : > { %913 = dma.done.wait (%p708_p3), %s516_s29, 256  }
 0x141   : > { %915 = vsyncadd (%p708_p3), %s516_s29, 4294967040  ;;  %s25_s20 = sadd.s32 1, %s938_s20   ;;  %s1237_s15 = smov %s922_s16 }
 0x142   : > { %p22_p5 = scmp.ge.s32.totalorder %s25_s20, 4   ;;  %s1238_s16 = smov %s926_s17 }
 0x143   : > { %s1239_s17 = smov %s1072_s28  ;;  %s1240_s18 = smov %s934_s19 }
 0x144   : > { %s1241_s19 = smov %s1243_s5  ;;  %24 = sbr.rel (!%p22_p5) target bundleno = 11 (0xb), region = 100 }
 0x149   :  { %521 = vsyncpa [#allocation3], 1 }
 0x14a   :  { %523 = vsyncpa [#allocation3 + $0x1], 1 }
 0x14b   :  { %524 = vsyncpa [#allocation6], 1 }
 0x14c   :  { %525 = vsyncpa [#allocation4], 1 }
 0x14d   :  { %527 = vsyncpa [#allocation4 + $0x1], 1 }
 0x14e   :  { %528 = vsyncpa [#allocation9], 1 }
 0x14f   :  { %530 = vsyncpa [#allocation9 + $0x1], 1 }

</bundles_post_ra>
